<compile_context>
chip_gen: v7x
topology: tpu7x:2x2x1
jax: 0.10.0
libtpu: 0.0.40
codegen_flags: <defaults>
</compile_context>

<pallas_src>
import functools

import jax
import jax.numpy as jnp
from jax import lax
from jax.experimental import pallas as pl
from jax.experimental.pallas import tpu as pltpu


def _upsample_conv3x3_kernel(cur_ref, prev_ref, next_ref, wmix_ref, place_ref,
                             colmask_ref, bias_ref, o_ref, *, width):
    # cur_ref/prev_ref/next_ref : (1, Cin, L)  L = TI*W (TI input rows, lanes = r*W + j)
    # wmix_ref   : (4*Cout, 9*Cin)  parity/source folded channel-mix weights
    # place_ref  : (4, L, 4*L)      0/1 parity-plane placement (row+column interleave)
    # colmask_ref: (2, L)           left/right column zero-pad masks
    # bias_ref   : (Cout, 1)
    # o_ref      : (1, Cout, 4*L)   2*TI output rows x W2 columns, flattened, lane-dense
    f32 = jnp.float32
    c_out = bias_ref.shape[0]
    L = cur_ref.shape[2]
    W = width

    ib = pl.program_id(1)
    nb = pl.num_programs(1)

    cur = cur_ref[0].astype(f32)                                  # rows [ib*TI, ib*TI+TI)
    # Halo rows come from the neighbouring row blocks (index maps are clamped at the
    # image edges); zeroing the clamped row realises the conv zero padding top/bottom.
    above = prev_ref[0, :, L - W:].astype(f32) * (ib > 0).astype(f32)       # row ib*TI-1
    below = next_ref[0, :, :W].astype(f32) * (ib < nb - 1).astype(f32)      # row ib*TI+TI

    # Row-shifted slabs (rows packed along lanes, W columns per row).
    prev = jnp.concatenate([above, cur[:, :L - W]], axis=1)       # x[row r-1] at slot r
    nxt = jnp.concatenate([cur[:, W:], below], axis=1)            # x[row r+1] at slot r

    # Column-shifted variants via XLU rolls; the masks zero the per-row wrap lanes,
    # which realises the conv zero padding at the left/right image edges.
    mask_l = colmask_ref[0:1, :]                                  # 0 where j == 0
    mask_r = colmask_ref[1:2, :]                                  # 0 where j == W-1

    def col_variants(s):
        return (pltpu.roll(s, 1, axis=1) * mask_l,                # x[.., j-1] at slot j
                s,                                                # x[.., j]
                pltpu.roll(s, L - 1, axis=1) * mask_r)            # x[.., j+1] at slot j

    slabs = col_variants(prev) + col_variants(cur) + col_variants(nxt)
    s_all = jnp.concatenate(slabs, axis=0)                        # (9*Cin, L)

    # One channel-mix matmul for all four (row-parity, col-parity) output planes.
    y = jnp.dot(wmix_ref[...], s_all, preferred_element_type=f32)  # (4*Cout, L)

    # Parity-plane placement (row & column interleave) on the MXU, bias folded into the
    # epilogue, then a single lane-dense block store.
    out = jnp.dot(y[0:c_out], place_ref[0], preferred_element_type=f32)
    for p in range(1, 4):
        out += jnp.dot(y[p * c_out:(p + 1) * c_out], place_ref[p],
                       preferred_element_type=f32)
    out += bias_ref[...]                                          # (Cout, 1) broadcast
    o_ref[0] = out.astype(o_ref.dtype)


def _fold_weights(w_oihw):
    """(Cout, Cin, 3, 3) -> (4*Cout, 9*Cin) parity/source folded channel-mix matrix."""
    c_out, c_in = w_oihw.shape[0], w_oihw.shape[1]
    w = w_oihw.astype(jnp.float32)
    # Which kernel taps hit which input source {prev, cur, next} / {left, center, right},
    # per output-row / output-column parity (nearest 2x upsample + pad 1 folding).
    R = jnp.array([[[1, 0, 0], [0, 1, 1], [0, 0, 0]],             # even output rows/cols
                   [[0, 0, 0], [1, 1, 0], [0, 0, 1]]],            # odd output rows/cols
                  jnp.float32)
    folded = jnp.einsum('arh,bcw,oihw->aborci', R, R, w)          # (2,2,Cout,3,3,Cin)
    # rows: (2a+b)*Cout + co ; cols: (3*rowsrc + colsrc)*Cin + ci
    return folded.reshape(4 * c_out, 9 * c_in)


def _placement(ti, w):
    """(4, L, 4L) 0/1 mats scattering plane (a,b) lane r*W+j to lane (2r+a)*2W + 2j+b."""
    L = ti * w
    src = jnp.arange(L)
    r, j = src // w, src % w
    dst_all = jnp.arange(4 * L)
    mats = []
    for a in (0, 1):
        for b in (0, 1):
            dst = 4 * w * r + 2 * w * a + 2 * j + b
            mats.append((dst[:, None] == dst_all[None, :]).astype(jnp.float32))
    return jnp.stack(mats)


def _col_masks(ti, w):
    j = jnp.arange(ti * w) % w
    return jnp.stack([(j != 0), (j != w - 1)]).astype(jnp.float32)   # (2, L)


def upsample_c_forward(x_nchw, w_oihw, bias, *, max_block_lanes=128):
    """UpsampleC.forward: nearest 2x upsample followed by 3x3 same-pad conv (NCHW)."""
    n, c_in, h, w = x_nchw.shape
    c_out = w_oihw.shape[0]
    h2, w2 = 2 * h, 2 * w

    # Input rows per grid step (TI): the largest divisor of H whose lane-flattened block
    # TI*W stays within max_block_lanes (keeps blocks lane-dense for the test shapes).
    ti = 1
    for cand in range(1, h + 1):
        if h % cand == 0 and cand * w <= max_block_lanes:
            ti = cand
    L = ti * w
    nb = h // ti

    wmix = _fold_weights(w_oihw)                # (4*Cout, 9*Cin)
    place = _placement(ti, w)                   # (4, L, 4L)
    cmask = _col_masks(ti, w)                   # (2, L)
    b2 = bias.reshape(c_out, 1).astype(jnp.float32)

    x_flat = x_nchw.reshape(n, c_in, h * w)     # free NCHW reshape, lane-dense rows

    kernel = functools.partial(_upsample_conv3x3_kernel, width=w)

    out_flat = pl.pallas_call(
        kernel,
        out_shape=jax.ShapeDtypeStruct((n, c_out, h2 * w2), x_nchw.dtype),
        grid=(n, nb),
        in_specs=[
            # current row block + the two neighbouring blocks (1-row halo source)
            pl.BlockSpec((1, c_in, L), lambda b, ib: (b, 0, ib)),
            pl.BlockSpec((1, c_in, L), lambda b, ib: (b, 0, jnp.maximum(ib - 1, 0))),
            pl.BlockSpec((1, c_in, L),
                         lambda b, ib: (b, 0, jnp.minimum(ib + 1, nb - 1))),
            # grid-invariant folded weights / placement / masks / bias
            pl.BlockSpec((4 * c_out, 9 * c_in), lambda b, ib: (0, 0)),
            pl.BlockSpec((4, L, 4 * L), lambda b, ib: (0, 0, 0)),
            pl.BlockSpec((2, L), lambda b, ib: (0, 0)),
            pl.BlockSpec((c_out, 1), lambda b, ib: (0, 0)),
        ],
        # One lane-dense (Cout, 2*TI*W2) store per step; (N, Cout, H2*W2) is a free
        # reshape of the NCHW output.
        out_specs=pl.BlockSpec((1, c_out, 4 * L), lambda b, ib: (b, 0, ib)),
        compiler_params=pltpu.CompilerParams(
            dimension_semantics=("parallel", "parallel")),
    )(x_flat, x_flat, x_flat, wmix, place, cmask, b2)

    return out_flat.reshape(n, c_out, h2, w2)


def reference_forward(x_nchw, w_oihw, bias):
    # Pure-JAX reference of UpsampleC (nearest 2x + conv2d same) for the sanity check.
    x_up = jnp.repeat(jnp.repeat(x_nchw, 2, axis=2), 2, axis=3)
    y = lax.conv_general_dilated(
        x_up, w_oihw, window_strides=(1, 1), padding="SAME",
        dimension_numbers=("NCHW", "OIHW", "NCHW"))
    return y + bias.reshape(1, -1, 1, 1)


if __name__ == "__main__":
    key = jax.random.PRNGKey(0)
    kx, kw, kb = jax.random.split(key, 3)

    # Small shapes consistent with the module: N=2, dim=4, spatial 16x16, dim_out=8.
    N, Cin, H, W = 2, 4, 16, 16
    Cout = 8

    x = jax.random.normal(kx, (N, Cin, H, W), dtype=jnp.float32)

    # PyTorch Conv2d default init: U(-bound, bound), bound = 1/sqrt(Cin*3*3).
    bound = 1.0 / jnp.sqrt(jnp.float32(Cin * 3 * 3))
    w = jax.random.uniform(kw, (Cout, Cin, 3, 3), minval=-bound, maxval=bound,
                           dtype=jnp.float32)
    b = jax.random.uniform(kb, (Cout,), minval=-bound, maxval=bound,
                           dtype=jnp.float32)

    fwd = jax.jit(upsample_c_forward)
    out = jax.block_until_ready(fwd(x, w, b))
    ref = jax.block_until_ready(reference_forward(x, w, b))

    assert out.shape == (N, Cout, 2 * H, 2 * W)
    err = float(jnp.max(jnp.abs(out - ref)))
    assert jnp.allclose(out, ref, atol=1e-4, rtol=1e-4), err

    print("KERNEL_OK")
</pallas_src>

<mosaic_0001>
module attributes {stable_mosaic.version = 11 : i64} {
  func.func @_upsample_conv3x3_kernel(%arg0: i32, %arg1: i32, %arg2: memref<1x4x128xf32, #tpu.memory_space<vmem>>, %arg3: memref<1x4x128xf32, #tpu.memory_space<vmem>>, %arg4: memref<1x4x128xf32, #tpu.memory_space<vmem>>, %arg5: memref<32x36xf32, #tpu.memory_space<vmem>>, %arg6: memref<4x128x512xf32, #tpu.memory_space<vmem>>, %arg7: memref<2x128xf32, #tpu.memory_space<vmem>>, %arg8: memref<8x1xf32, #tpu.memory_space<vmem>>, %arg9: memref<1x8x512xf32, #tpu.memory_space<vmem>>) attributes {dimension_semantics = [#tpu.dimension_semantics<parallel>, #tpu.dimension_semantics<parallel>], iteration_bounds = array<i64: 2, 2>, scalar_prefetch = 0 : i64, scratch_operands = 0 : i64, tpu.core_type = #tpu.core_type<tc>, window_params = [{transform_indices = @transform_0, window_bounds = array<i64: 1, 4, 128>}, {transform_indices = @transform_1, window_bounds = array<i64: 1, 4, 128>}, {transform_indices = @transform_2, window_bounds = array<i64: 1, 4, 128>}, {pipeline_mode = #tpu.pipeline_mode<synchronous>, transform_indices = @transform_3, window_bounds = array<i64: 32, 36>}, {pipeline_mode = #tpu.pipeline_mode<synchronous>, transform_indices = @transform_4, window_bounds = array<i64: 4, 128, 512>}, {pipeline_mode = #tpu.pipeline_mode<synchronous>, transform_indices = @transform_5, window_bounds = array<i64: 2, 128>}, {pipeline_mode = #tpu.pipeline_mode<synchronous>, transform_indices = @transform_6, window_bounds = array<i64: 8, 1>}, {transform_indices = @transform_7, window_bounds = array<i64: 1, 8, 512>}]} {
    %c0 = arith.constant 0 : index
    %c0_0 = arith.constant 0 : index
    %c0_1 = arith.constant 0 : index
    %0 = vector.load %arg2[%c0, %c0_0, %c0_1] : memref<1x4x128xf32, #tpu.memory_space<vmem>>, vector<1x4x128xf32>
    %1 = vector.shape_cast %0 : vector<1x4x128xf32> to vector<4x128xf32>
    %c0_2 = arith.constant 0 : index
    %c0_3 = arith.constant 0 : index
    %c112 = arith.constant 112 : index
    %2 = vector.load %arg3[%c0_2, %c0_3, %c112] : memref<1x4x128xf32, #tpu.memory_space<vmem>>, vector<1x4x16xf32>
    %3 = vector.shape_cast %2 : vector<1x4x16xf32> to vector<4x16xf32>
    %c0_i32 = arith.constant 0 : i32
    %4 = arith.cmpi sgt, %arg1, %c0_i32 : i32
    %5 = arith.extui %4 : i1 to i32
    %6 = arith.sitofp %5 : i32 to f32
    %7 = vector.broadcast %6 : f32 to vector<4x16xf32>
    %8 = arith.mulf %3, %7 : vector<4x16xf32>
    %c0_4 = arith.constant 0 : index
    %c0_5 = arith.constant 0 : index
    %c0_6 = arith.constant 0 : index
    %9 = vector.load %arg4[%c0_4, %c0_5, %c0_6] : memref<1x4x128xf32, #tpu.memory_space<vmem>>, vector<1x4x16xf32>
    %10 = vector.shape_cast %9 : vector<1x4x16xf32> to vector<4x16xf32>
    %c1_i32 = arith.constant 1 : i32
    %11 = arith.cmpi slt, %arg1, %c1_i32 : i32
    %12 = arith.extui %11 : i1 to i32
    %13 = arith.sitofp %12 : i32 to f32
    %14 = vector.broadcast %13 : f32 to vector<4x16xf32>
    %15 = arith.mulf %10, %14 : vector<4x16xf32>
    %16 = vector.extract_strided_slice %1 {offsets = [0, 0], sizes = [4, 112], strides = [1, 1]} : vector<4x128xf32> to vector<4x112xf32>
    %17 = tpu.concatenate %8, %16 in 1 : vector<4x16xf32>, vector<4x112xf32> -> vector<4x128xf32>
    %18 = vector.extract_strided_slice %1 {offsets = [0, 16], sizes = [4, 112], strides = [1, 1]} : vector<4x128xf32> to vector<4x112xf32>
    %19 = tpu.concatenate %18, %15 in 1 : vector<4x112xf32>, vector<4x16xf32> -> vector<4x128xf32>
    %c0_7 = arith.constant 0 : index
    %c0_8 = arith.constant 0 : index
    %20 = vector.load %arg7[%c0_7, %c0_8] : memref<2x128xf32, #tpu.memory_space<vmem>>, vector<1x128xf32>
    %c1 = arith.constant 1 : index
    %c0_9 = arith.constant 0 : index
    %21 = vector.load %arg7[%c1, %c0_9] : memref<2x128xf32, #tpu.memory_space<vmem>>, vector<1x128xf32>
    %c1_i32_10 = arith.constant 1 : i32
    %22 = tpu.dynamic_rotate %17 by %c1_i32_10 dim 1 : vector<4x128xf32>, i32 -> vector<4x128xf32>
    %23 = vector.broadcast %20 : vector<1x128xf32> to vector<4x128xf32>
    %24 = arith.mulf %22, %23 : vector<4x128xf32>
    %c127_i32 = arith.constant 127 : i32
    %25 = tpu.dynamic_rotate %17 by %c127_i32 dim 1 : vector<4x128xf32>, i32 -> vector<4x128xf32>
    %26 = vector.broadcast %21 : vector<1x128xf32> to vector<4x128xf32>
    %27 = arith.mulf %25, %26 : vector<4x128xf32>
    %c1_i32_11 = arith.constant 1 : i32
    %28 = tpu.dynamic_rotate %1 by %c1_i32_11 dim 1 : vector<4x128xf32>, i32 -> vector<4x128xf32>
    %29 = vector.broadcast %20 : vector<1x128xf32> to vector<4x128xf32>
    %30 = arith.mulf %28, %29 : vector<4x128xf32>
    %c127_i32_12 = arith.constant 127 : i32
    %31 = tpu.dynamic_rotate %1 by %c127_i32_12 dim 1 : vector<4x128xf32>, i32 -> vector<4x128xf32>
    %32 = vector.broadcast %21 : vector<1x128xf32> to vector<4x128xf32>
    %33 = arith.mulf %31, %32 : vector<4x128xf32>
    %c1_i32_13 = arith.constant 1 : i32
    %34 = tpu.dynamic_rotate %19 by %c1_i32_13 dim 1 : vector<4x128xf32>, i32 -> vector<4x128xf32>
    %35 = vector.broadcast %20 : vector<1x128xf32> to vector<4x128xf32>
    %36 = arith.mulf %34, %35 : vector<4x128xf32>
    %c127_i32_14 = arith.constant 127 : i32
    %37 = tpu.dynamic_rotate %19 by %c127_i32_14 dim 1 : vector<4x128xf32>, i32 -> vector<4x128xf32>
    %38 = vector.broadcast %21 : vector<1x128xf32> to vector<4x128xf32>
    %39 = arith.mulf %37, %38 : vector<4x128xf32>
    %40 = tpu.concatenate %24, %17, %27, %30, %1, %33, %36, %19, %39 in 0 : vector<4x128xf32>, vector<4x128xf32>, vector<4x128xf32>, vector<4x128xf32>, vector<4x128xf32>, vector<4x128xf32>, vector<4x128xf32>, vector<4x128xf32>, vector<4x128xf32> -> vector<36x128xf32>
    %c0_15 = arith.constant 0 : index
    %c0_16 = arith.constant 0 : index
    %41 = vector.load %arg5[%c0_15, %c0_16] : memref<32x36xf32, #tpu.memory_space<vmem>>, vector<32x36xf32>
    %cst = arith.constant dense<0.000000e+00> : vector<32x128xf32>
    %42 = tpu.matmul %41, %40, %cst {dimension_numbers = #tpu.dot_dimension_numbers<[1], [0], [0], [1], [0, 0, 1, 1], [], []>} : vector<32x36xf32>, vector<36x128xf32>, vector<32x128xf32> -> vector<32x128xf32>
    %43 = vector.extract_strided_slice %42 {offsets = [0, 0], sizes = [8, 128], strides = [1, 1]} : vector<32x128xf32> to vector<8x128xf32>
    %c0_17 = arith.constant 0 : index
    %c0_18 = arith.constant 0 : index
    %c0_19 = arith.constant 0 : index
    %44 = vector.load %arg6[%c0_17, %c0_18, %c0_19] : memref<4x128x512xf32, #tpu.memory_space<vmem>>, vector<1x128x512xf32>
    %45 = vector.shape_cast %44 : vector<1x128x512xf32> to vector<128x512xf32>
    %cst_20 = arith.constant dense<0.000000e+00> : vector<8x512xf32>
    %46 = tpu.matmul %43, %45, %cst_20 {dimension_numbers = #tpu.dot_dimension_numbers<[1], [0], [0], [1], [0, 0, 1, 1], [], []>} : vector<8x128xf32>, vector<128x512xf32>, vector<8x512xf32> -> vector<8x512xf32>
    %47 = vector.extract_strided_slice %42 {offsets = [8, 0], sizes = [8, 128], strides = [1, 1]} : vector<32x128xf32> to vector<8x128xf32>
    %c1_21 = arith.constant 1 : index
    %c0_22 = arith.constant 0 : index
    %c0_23 = arith.constant 0 : index
    %48 = vector.load %arg6[%c1_21, %c0_22, %c0_23] : memref<4x128x512xf32, #tpu.memory_space<vmem>>, vector<1x128x512xf32>
    %49 = vector.shape_cast %48 : vector<1x128x512xf32> to vector<128x512xf32>
    %cst_24 = arith.constant dense<0.000000e+00> : vector<8x512xf32>
    %50 = tpu.matmul %47, %49, %cst_24 {dimension_numbers = #tpu.dot_dimension_numbers<[1], [0], [0], [1], [0, 0, 1, 1], [], []>} : vector<8x128xf32>, vector<128x512xf32>, vector<8x512xf32> -> vector<8x512xf32>
    %51 = arith.addf %46, %50 : vector<8x512xf32>
    %52 = vector.extract_strided_slice %42 {offsets = [16, 0], sizes = [8, 128], strides = [1, 1]} : vector<32x128xf32> to vector<8x128xf32>
    %c2 = arith.constant 2 : index
    %c0_25 = arith.constant 0 : index
    %c0_26 = arith.constant 0 : index
    %53 = vector.load %arg6[%c2, %c0_25, %c0_26] : memref<4x128x512xf32, #tpu.memory_space<vmem>>, vector<1x128x512xf32>
    %54 = vector.shape_cast %53 : vector<1x128x512xf32> to vector<128x512xf32>
    %cst_27 = arith.constant dense<0.000000e+00> : vector<8x512xf32>
    %55 = tpu.matmul %52, %54, %cst_27 {dimension_numbers = #tpu.dot_dimension_numbers<[1], [0], [0], [1], [0, 0, 1, 1], [], []>} : vector<8x128xf32>, vector<128x512xf32>, vector<8x512xf32> -> vector<8x512xf32>
    %56 = arith.addf %51, %55 : vector<8x512xf32>
    %57 = vector.extract_strided_slice %42 {offsets = [24, 0], sizes = [8, 128], strides = [1, 1]} : vector<32x128xf32> to vector<8x128xf32>
    %c3 = arith.constant 3 : index
    %c0_28 = arith.constant 0 : index
    %c0_29 = arith.constant 0 : index
    %58 = vector.load %arg6[%c3, %c0_28, %c0_29] : memref<4x128x512xf32, #tpu.memory_space<vmem>>, vector<1x128x512xf32>
    %59 = vector.shape_cast %58 : vector<1x128x512xf32> to vector<128x512xf32>
    %cst_30 = arith.constant dense<0.000000e+00> : vector<8x512xf32>
    %60 = tpu.matmul %57, %59, %cst_30 {dimension_numbers = #tpu.dot_dimension_numbers<[1], [0], [0], [1], [0, 0, 1, 1], [], []>} : vector<8x128xf32>, vector<128x512xf32>, vector<8x512xf32> -> vector<8x512xf32>
    %61 = arith.addf %56, %60 : vector<8x512xf32>
    %c0_31 = arith.constant 0 : index
    %c0_32 = arith.constant 0 : index
    %62 = vector.load %arg8[%c0_31, %c0_32] : memref<8x1xf32, #tpu.memory_space<vmem>>, vector<8x1xf32>
    %63 = vector.broadcast %62 : vector<8x1xf32> to vector<8x512xf32>
    %64 = arith.addf %61, %63 : vector<8x512xf32>
    %c0_33 = arith.constant 0 : index
    %c0_34 = arith.constant 0 : index
    %c0_35 = arith.constant 0 : index
    %65 = vector.load %arg9[%c0_33, %c0_34, %c0_35] : memref<1x8x512xf32, #tpu.memory_space<vmem>>, vector<1x8x512xf32>
    %66 = vector.shape_cast %65 : vector<1x8x512xf32> to vector<8x512xf32>
    %67 = vector.shape_cast %64 : vector<8x512xf32> to vector<1x8x512xf32>
    tpu.vector_store %arg9[%c0_33, %c0_34, %c0_35], %67 {strides = array<i32>} : memref<1x8x512xf32, #tpu.memory_space<vmem>>, vector<1x8x512xf32>,
    return
  }
  func.func @transform_0(%arg0: i32, %arg1: i32) -> (i32, i32, i32) {
    %c0_i32 = arith.constant 0 : i32
    %c0_i32_0 = arith.constant 0 : i32
    return %arg0, %c0_i32, %arg1 : i32, i32, i32
  }
  func.func @transform_1(%arg0: i32, %arg1: i32) -> (i32, i32, i32) {
    %c1_i32 = arith.constant 1 : i32
    %0 = arith.subi %arg1, %c1_i32 : i32
    %c0_i32 = arith.constant 0 : i32
    %1 = arith.maxsi %0, %c0_i32 : i32
    %c0_i32_0 = arith.constant 0 : i32
    %c0_i32_1 = arith.constant 0 : i32
    return %arg0, %c0_i32_0, %1 : i32, i32, i32
  }
  func.func @transform_2(%arg0: i32, %arg1: i32) -> (i32, i32, i32) {
    %c1_i32 = arith.constant 1 : i32
    %0 = arith.addi %arg1, %c1_i32 : i32
    %c1_i32_0 = arith.constant 1 : i32
    %1 = arith.minsi %0, %c1_i32_0 : i32
    %c0_i32 = arith.constant 0 : i32
    %c0_i32_1 = arith.constant 0 : i32
    return %arg0, %c0_i32, %1 : i32, i32, i32
  }
  func.func @transform_3(%arg0: i32, %arg1: i32) -> (i32, i32) {
    %c0_i32 = arith.constant 0 : i32
    %c0_i32_0 = arith.constant 0 : i32
    %c0_i32_1 = arith.constant 0 : i32
    return %c0_i32, %c0_i32_0 : i32, i32
  }
  func.func @transform_4(%arg0: i32, %arg1: i32) -> (i32, i32, i32) {
    %c0_i32 = arith.constant 0 : i32
    %c0_i32_0 = arith.constant 0 : i32
    %c0_i32_1 = arith.constant 0 : i32
    %c0_i32_2 = arith.constant 0 : i32
    return %c0_i32, %c0_i32_0, %c0_i32_1 : i32, i32, i32
  }
  func.func @transform_5(%arg0: i32, %arg1: i32) -> (i32, i32) {
    %c0_i32 = arith.constant 0 : i32
    %c0_i32_0 = arith.constant 0 : i32
    %c0_i32_1 = arith.constant 0 : i32
    return %c0_i32, %c0_i32_0 : i32, i32
  }
  func.func @transform_6(%arg0: i32, %arg1: i32) -> (i32, i32) {
    %c0_i32 = arith.constant 0 : i32
    %c0_i32_0 = arith.constant 0 : i32
    %c0_i32_1 = arith.constant 0 : i32
    return %c0_i32, %c0_i32_0 : i32, i32
  }
  func.func @transform_7(%arg0: i32, %arg1: i32) -> (i32, i32, i32) {
    %c0_i32 = arith.constant 0 : i32
    %c0_i32_0 = arith.constant 0 : i32
    return %arg0, %c0_i32, %arg1 : i32, i32, i32
  }
}

</mosaic_0001>

<bundles_post_ra>
// kernel: upsample_c_forward.1
= control target key start
LH: loop header
LB: loop body
LE: loop exit
PB: predicated region body
PF: predicated region fallthrough
CT: control target
= control target key end

     0   :  { %s2236_s24 = smov 0   ;;  %s2238_s25 = smov 0   ;;  %s3153_s0 = inlined_call_operand.vmem [shape: f32[2,4,256], index: 0, kind: input, shape index: {}, may-alias: {0,1,2}]   ;;  %s3154_s1 = inlined_call_operand.vmem [shape: f32[2,4,256], index: 1, kind: input, shape index: {}, may-alias: {0,1,2}]   ;;  %s3155_s2 = inlined_call_operand.vmem [shape: f32[2,4,256], index: 2, kind: input, shape index: {}, may-alias: {0,1,2}]   ;;  %s3156_s3 = inlined_call_operand.vmem [shape: f32[32,36], index: 3, kind: input, shape index: {}]   ;;  %s3157_s4 = inlined_call_operand.vmem [shape: f32[4,128,512], index: 4, kind: input, shape index: {}]   ;;  %s3158_s5 = inlined_call_operand.vmem [shape: f32[2,128], index: 5, kind: input, shape index: {}]   ;;  %s3159_s6 = inlined_call_operand.vmem [shape: f32[8,1], index: 6, kind: input, shape index: {}]   ;;  %s3160_s7 = inlined_call_operand.vmem [shape: f32[2,8,1024], index: 7, kind: output, shape index: {}]  }
   0x1   :  { %s2240_s26 = smov 0   ;;  %s2242_s27 = smov 0  }
   0x2   :  { %s2244_s28 = smov 0  }
   0x3 LB: > { %s26_s29 = sadd.s32 1, %s2180_s26  ;;  %s29_s30 = sadd.s32 1, %s2184_s27  ;;  %s2188_s28 = sphi %s2244_s28, %s17_s28   ;;  %s2184_s27 = sphi %s2242_s27, %s3165_s27   ;;  %s2180_s26 = sphi %s2240_s26, %s3164_s26   ;;  %s2176_s25 = sphi %s2238_s25, %s3163_s25   ;;  %s2172_s24 = sphi %s2236_s24, %s3162_s24  }
   0x4   : > { %p27_p0 = scmp.ge.s32.totalorder %s26_s29, 2  ;;  %p1580_p1 = scmp.ge.s32.totalorder %s2188_s28, 1 }
   0x5   : > { %p310_p2 = scmp.lt.s32.totalorder %s2188_s28, 5 }
   0x6   : > { %s3167_s29 = smov (%p27_p0, %s26_s29), 0  ;;  %s3169_s30 = smov (!%p27_p0, %s29_s30), %s2184_s27 }
   0x7   : > { %p311_p3 = pnand %p1580_p1, %p310_p2  ;;  %p31_p4 = scmp.ge.s32.totalorder %s3169_s30, 2 }
   0x8   : > { %p371_p5 = scmp.lt.s32.totalorder (!%p311_p3), %s2176_s25, 1  ;;  %s1583_s8 = sadd.s32 (!%p311_p3), 4294967295, %s2172_s24  ;;  %vm438_vm0 = vcmask (!%p311_p3), 130048   ;;  %vm447_vm1 = vcmask (!%p311_p3), 916480   ;;  %v494_v12 = vld [vmem:[%s3156_s3] sm:$0xff] (!%p311_p3)  ;;  %vm498_vm2 = vcmask (!%p311_p3), 293888  }
   0x9   : > { %s3171_s30 = smov (%p31_p4, %s3169_s30), 0  ;;  %314 = sbr.rel (%p311_p3) target bundleno = 804 (0x324), region = 48 }
   0xa   : > { %p380_p6 = scmp.gt.s32.totalorder (!%p311_p3), %s1583_s8, 0  ;;  %p1584_p7 = scmp.lt.s32.totalorder (!%p311_p3), %s1583_s8, 1  ;;  %1821 = vmatprep.mubr.msk.f32.mxu0 (!%p311_p3), %vm498_vm2, %v494_v12  ;;  %v1607_v14 = vld [vmem:[%s3157_s4 + $0x208] sm:$0xff] (!%p311_p3)  ;;  %v1606_v17 = vld [vmem:[%s3157_s4 + $0x200] sm:$0xff] (!%p311_p3)  ;;  %vm489_vm3 = vcmask (!%p311_p3), 1043456  }
   0xb   : > { %p419_p8 = scmp.gt.s32.totalorder (!%p311_p3), %s2172_s24, 0  ;;  %p373_p9 = scmp.lt.s32.totalorder (!%p311_p3), %s2172_s24, 1  ;;  %v1611_v15 = vld [vmem:[%s3157_s4 + $0x228] sm:$0xff] (!%p311_p3)  ;;  %v1610_v18 = vld [vmem:[%s3157_s4 + $0x220] sm:$0xff] (!%p311_p3) }
   0xc   : > { %s393_s15 = sadd.s32 (!%p311_p3), 1, %s2172_s24  ;;  %v1835_v16 = vpack.c.bf16 (!%p311_p3), %v1611_v15, %v1607_v14  ;;  %v1837_v19 = vpack.c.bf16 (!%p311_p3), %v1610_v18, %v1606_v17  ;;  %v1615_v20 = vld [vmem:[%s3157_s4 + $0x248] sm:$0xff] (!%p311_p3)  ;;  %v1614_v23 = vld [vmem:[%s3157_s4 + $0x240] sm:$0xff] (!%p311_p3) }
   0xd   : > { %p2281_p10 = scmp.lt.s32.totalorder (!%p311_p3), %s393_s15, 1  ;;  %v1619_v21 = vld [vmem:[%s3157_s4 + $0x268] sm:$0xff] (!%p311_p3)  ;;  %v1618_v24 = vld [vmem:[%s3157_s4 + $0x260] sm:$0xff] (!%p311_p3) }
   0xe   : > { %1836 = vmatprep.subr.bf16.mxu1 (!%p311_p3), %v1835_v16  ;;  %v1839_v22 = vpack.c.bf16 (!%p311_p3), %v1619_v21, %v1615_v20  ;;  %v1841_v25 = vpack.c.bf16 (!%p311_p3), %v1618_v24, %v1614_v23  ;;  %v1623_v26 = vld [vmem:[%s3157_s4 + $0x288] sm:$0xff] (!%p311_p3)  ;;  %v1622_v29 = vld [vmem:[%s3157_s4 + $0x280] sm:$0xff] (!%p311_p3)  ;;  %v1609_v23 = vld [vmem:[%s3157_s4 + $0x218] sm:$0xff] (!%p311_p3) }
   0xf   : > { %1838 = vmatpush1.bf16.msra.mxu1 (!%p311_p3), %v1837_v19  ;;  %v1627_v27 = vld [vmem:[%s3157_s4 + $0x2a8] sm:$0xff] (!%p311_p3)  ;;  %v1626_v30 = vld [vmem:[%s3157_s4 + $0x2a0] sm:$0xff] (!%p311_p3)  ;;  %v1613_v24 = vld [vmem:[%s3157_s4 + $0x238] sm:$0xff] (!%p311_p3) }
  0x10   : > { %s3173_s25 = smov (!%p371_p5, %s2176_s25), 1  ;;  %s3175_s8 = smov (!%p380_p6, %s1583_s8), 0  ;;  %1840 = vmatprep.subr.bf16.mxu1 %v1839_v22  ;;  %v1843_v28 = vpack.c.bf16 %v1627_v27, %v1623_v26  ;;  %v1845_v31 = vpack.c.bf16 %v1626_v30, %v1622_v29  ;;  %v1631_v32 = vld [vmem:[%s3157_s4 + $0x2c8] sm:$0xff]  ;;  %v1630_v35 = vld [vmem:[%s3157_s4 + $0x2c0] sm:$0xff]  ;;  %v1617_v26 = vld [vmem:[%s3157_s4 + $0x258] sm:$0xff] }
  0x11   : > { %s1581_s9 = sshll.u32 %s3173_s25, 1  ;;  %s3177_s8 = smov (!%p1584_p7, %s3175_s8), 1  ;;  %v1635_v33 = vld [vmem:[%s3157_s4 + $0x2e8] sm:$0xff]  ;;  %v1634_v36 = vld [vmem:[%s3157_s4 + $0x2e0] sm:$0xff]  ;;  %v1621_v27 = vld [vmem:[%s3157_s4 + $0x278] sm:$0xff] }
  0x12   : > { %s387_s10 = sadd.s32 %s3177_s8, %s1581_s9  ;;  %s3179_s15 = smov (!%p2281_p10, %s393_s15), 1  ;;  %v1847_v34 = vpack.c.bf16 %v1635_v33, %v1631_v32  ;;  %v1639_v37 = vld [vmem:[%s3157_s4 + $0x308] sm:$0xff]  ;;  %v1849_v39 = vpack.c.bf16 %v1634_v36, %v1630_v35  ;;  %v1638_v41 = vld [vmem:[%s3157_s4 + $0x300] sm:$0xff]  ;;  %v1871_v32 = vpack.c.bf16 %v1621_v27, %v1617_v26  ;;  %v1616_v33 = vld [vmem:[%s3157_s4 + $0x250] sm:$0xff] }
  0x13   : > { %s1590_s11 = sshll.u32 %s387_s10, 2  ;;  %s2190_s10 = smov 16   ;;  %1842 = vmatpush1.bf16.msra.mxu1 %v1841_v25  ;;  %v1643_v38 = vld [vmem:[%s3157_s4 + $0x328] sm:$0xff]  ;;  %v1642_v42 = vld [vmem:[%s3157_s4 + $0x320] sm:$0xff]  ;;  %v1625_v35 = vld [vmem:[%s3157_s4 + $0x298] sm:$0xff] }
  0x14   : > { %s389_s14 = scalar_lea.vmem %s3154_s1, %s1590_s11  ;;  %s2191_s11 = smov 112   ;;  %1844 = vmatprep.subr.bf16.mxu1 %v1843_v28  ;;  %v1851_v40 = vpack.c.bf16 %v1643_v38, %v1639_v37  ;;  %v1647_v43 = vld [vmem:[%s3157_s4 + $0x348] sm:$0xff]  ;;  %v1853_v45 = vpack.c.bf16 %v1642_v42, %v1638_v41  ;;  %v1646_v47 = vld [vmem:[%s3157_s4 + $0x340] sm:$0xff]  ;;  %v1867_v28 = vpack.c.bf16 %v1613_v24, %v1609_v23  ;;  %v1629_v36 = vld [vmem:[%s3157_s4 + $0x2b8] sm:$0xff] }
  0x15   : > { %s420_s16 = scalar_select %p419_p8, 1, 0  ;;  %v418_v0 = vld [vmem:[%s389_s14] sm:$0xf]  ;;  %v1651_v44 = vld [vmem:[%s3157_s4 + $0x368] sm:$0xff]  ;;  %v497_v37 = vld [vmem:[%s3156_s3 + $0x18] sm:$0xff] }
  0x16   : > { %s374_s17 = scalar_select %p373_p9, %s2172_s24, 1  ;;  %v1855_v46 = vpack.c.bf16 %v1651_v44, %v1647_v43  ;;  %v1650_v48 = vld [vmem:[%s3157_s4 + $0x360] sm:$0xff]  ;;  %v1655_v49 = vld [vmem:[%s3157_s4 + $0x388] sm:$0xff]  ;;  %v1628_v41 = vld [vmem:[%s3157_s4 + $0x2b0] sm:$0xff] }
  0x17   : > { %s421_s18 = scvt.s32.f32 %s420_s16  ;;  %s3181_s15 = smov (!%p2281_p10, %s3179_s15), 1  ;;  %1846 = vmatpush1.bf16.msra.mxu1 %v1845_v31  ;;  %v1659_v50 = vld [vmem:[%s3157_s4 + $0x3a8] sm:$0xff]  ;;  %v1857_v51 = vpack.c.bf16 %v1650_v48, %v1646_v47  ;;  %v1654_v53 = vld [vmem:[%s3157_s4 + $0x380] sm:$0xff]  ;;  %v496_v31 = vld [vmem:[%s3156_s3 + $0x10] sm:$0xff] }
  0x18   : > { %s376_s20 = sadd.s32 %s1581_s9, %s374_s17  ;;  %s401_s14 = sadd.s32 %s1581_s9, %s3181_s15  ;;  %1848 = vmatprep.subr.bf16.mxu1 %v1847_v34  ;;  %v1859_v52 = vpack.c.bf16 %v1659_v50, %v1655_v49  ;;  %v1658_v54 = vld [vmem:[%s3157_s4 + $0x3a0] sm:$0xff]  ;;  %v1663_v55 = vld [vmem:[%s3157_s4 + $0x3c8] sm:$0xff]  ;;  %v1620_v34 = vld [vmem:[%s3157_s4 + $0x270] sm:$0xff] }
  0x19   : > { %v422_v1 = vstv %s421_s18  ;;  %s1582_s21 = sshll.u32 %s376_s20, 2  ;;  %s1595_s16 = sshll.u32 %s401_s14, 2  ;;  %v1667_v56 = vld [vmem:[%s3157_s4 + $0x3e8] sm:$0xff]  ;;  %v1861_v57 = vpack.c.bf16 %v1658_v54, %v1654_v53  ;;  %v1662_v59 = vld [vmem:[%s3157_s4 + $0x3c0] sm:$0xff]  ;;  %v1873_v38 = vpack.c.bf16 %v1620_v34, %v1616_v33  ;;  %v1633_v42 = vld [vmem:[%s3157_s4 + $0x2d8] sm:$0xff] }
  0x1a   : > { %v423_v2 = vmul.f32 %v422_v1, %v418_v0  ;;  %s378_s8 = scalar_lea.vmem %s3153_s0, %s1582_s21  ;;  %s403_s20 = scalar_lea.vmem %s3155_s2, %s1595_s16  ;;  %v1863_v58 = vpack.c.bf16 %v1667_v56, %v1663_v55  ;;  %v1666_v60 = vld [vmem:[%s3157_s4 + $0x3e0] sm:$0xff]  ;;  %v495_v29 = vld [vmem:[%s3156_s3 + $0x8] sm:$0xff]  ;;  %v1637_v43 = vld [vmem:[%s3157_s4 + $0x2f8] sm:$0xff] }
  0x1b   : > { %v2288_v3 = vld [vmem:[%s378_s8] sm:$0xf]  ;;  %s426_s12 = scalar_select %p373_p9, 1, 0  ;;  %1850 = vmatpush1.bf16.msra.mxu1 %v1849_v39  ;;  %v1865_v61 = vpack.c.bf16 %v1666_v60, %v1662_v59  ;;  %v1875_v39 = vpack.c.bf16 %v1629_v36, %v1625_v35  ;;  %v1636_v47 = vld [vmem:[%s3157_s4 + $0x2f0] sm:$0xff]  ;;  %v1641_v48 = vld [vmem:[%s3157_s4 + $0x318] sm:$0xff] }
  0x1c   : > { %431 = vrot.lane.b32.xlu0 %v423_v2, %s2190_s10  ;;  %440 = vrot.lane.b32.xlu1 %v2288_v3, %s2191_s11  ;;  %v424_v5 = vld [vmem:[%s403_s20] sm:$0xf]  ;;  %s2192_s21 = smov 1   ;;  %s2193_s9 = smov 127   ;;  %v1645_v49 = vld [vmem:[%s3157_s4 + $0x338] sm:$0xff] }
  0x1d   : > { %s427_s13 = scvt.s32.f32 %s426_s12  ;;  %1852 = vmatprep.subr.bf16.mxu1 %v1851_v40  ;;  %v1599_v62 = vld [vmem:[%s3158_s5] ss:$0 sm:$0xff]  ;;  %v1600_v1 = vld [vmem:[%s3158_s5 + $0x1] ss:$0 sm:$0xff]  ;;  %v1624_v40 = vld [vmem:[%s3157_s4 + $0x290] sm:$0xff] }
  0x1e   : > { %v1877_v44 = vpack.c.bf16 %v1628_v41, %v1624_v40  ;;  %v1644_v53 = vld [vmem:[%s3157_s4 + $0x330] sm:$0xff]  ;;  %v1649_v54 = vld [vmem:[%s3157_s4 + $0x358] sm:$0xff]  ;;  %v608_v24 = vld [vmem:[%s3157_s4 + $0x48] sm:$0xff] }
  0x1f   : > { %v428_v4 = vstv %s427_s13  ;;  %1854 = vmatpush1.bf16.msra.mxu1 %v1853_v45  ;;  %v1879_v45 = vpack.c.bf16 %v1637_v43, %v1633_v42  ;;  %v1653_v55 = vld [vmem:[%s3157_s4 + $0x378] sm:$0xff]  ;;  %v1652_v59 = vld [vmem:[%s3157_s4 + $0x370] sm:$0xff]  ;;  %v616_v34 = vld [vmem:[%s3157_s4 + $0x88] sm:$0xff] }
  0x20   : > { %435 = vrot.lane.b32.xlu0 %v2288_v3, %s2190_s10  ;;  %v429_v6 = vmul.f32 %v428_v4, %v424_v5  ;;  %1856 = vmatprep.subr.bf16.mxu1 %v1855_v46  ;;  %v1632_v46 = vld [vmem:[%s3157_s4 + $0x2d0] sm:$0xff]  ;;  %v1657_v60 = vld [vmem:[%s3157_s4 + $0x398] sm:$0xff]  ;;  %v620_v36 = vld [vmem:[%s3157_s4 + $0xa8] sm:$0xff] }
  0x21   : > { %v1881_v50 = vpack.c.bf16 %v1636_v47, %v1632_v46  ;;  %v605_v23 = vld [vmem:[%s3157_s4 + $0x30] sm:$0xff]  ;;  %v615_v42 = vld [vmem:[%s3157_s4 + $0x80] sm:$0xff] }
  0x22   : > { %444 = vrot.lane.b32.xlu1 %v429_v6, %s2191_s11  ;;  %v613_v33 = vld [vmem:[%s3157_s4 + $0x70] sm:$0xff]  ;;  %v619_v43 = vld [vmem:[%s3157_s4 + $0xa0] sm:$0xff] }
  0x23   : > { %1858 = vmatpush1.bf16.msra.mxu1 %v1857_v51  ;;  %v1883_v51 = vpack.c.bf16 %v1645_v49, %v1641_v48  ;;  %v617_v46 = vld [vmem:[%s3157_s4 + $0x90] sm:$0xff]  ;;  %v624_v48 = vld [vmem:[%s3157_s4 + $0xc8] sm:$0xff] }
  0x24   : > { %465 = vrot.lane.b32.xlu0 %v2288_v3, %s2192_s21  ;;  %1860 = vmatprep.subr.bf16.mxu1 %v1859_v52  ;;  %v1640_v52 = vld [vmem:[%s3157_s4 + $0x310] sm:$0xff]  ;;  %v628_v49 = vld [vmem:[%s3157_s4 + $0xe8] sm:$0xff] }
  0x25   : > { %v1885_v56 = vpack.c.bf16 %v1644_v53, %v1640_v52  ;;  %v621_v47 = vld [vmem:[%s3157_s4 + $0xb0] sm:$0xff] }
  0x27   : > { %1862 = vmatpush1.bf16.msra.mxu1 %v1861_v57  ;;  %v1887_v57 = vpack.c.bf16 %v1653_v55, %v1649_v54  ;;  %v1909_v54 = vpack.c.bf16 %v619_v43, %v615_v42  ;;  %v1941_v55 = vpack.c.bf16 %v621_v47, %v617_v46  ;;  %v655_v42 = vld [vmem:[%s3157_s4 + $0x1c0] sm:$0xff]  ;;  %v657_v46 = vld [vmem:[%s3157_s4 + $0x1d0] sm:$0xff] }
  0x28   : > { %1864 = vmatprep.subr.bf16.mxu1 %v1863_v58  ;;  %v1648_v58 = vld [vmem:[%s3157_s4 + $0x350] sm:$0xff]  ;;  %v659_v43 = vld [vmem:[%s3157_s4 + $0x1e0] sm:$0xff] }
  0x29   : > { %v661_v47 = vld [vmem:[%s3157_s4 + $0x1f0] sm:$0xff] }
  0x2b   : > { %1866 = vmatpush1.bf16.msra.mxu1 %v1865_v61  ;;  %v1661_v61 = vld [vmem:[%s3157_s4 + $0x3b8] sm:$0xff] }
  0x8e   : > { %v432_v7 = vpop.permute.xlu0 %431  ;;  %v441_v8 = vpop.permute.xlu1 %440 }
  0x92   : > { %v436_v9 = vpop.permute.xlu0 %435 }
  0x93   : > { %v2302_v10 = vsel %vm438_vm0, %v432_v7, %v436_v9 }
  0x94   : > { %458 = vrot.lane.b32.xlu0 %v2302_v10, %s2193_s9  ;;  %451 = vrot.lane.b32.xlu1 %v2302_v10, %s2192_s21  ;;  %v445_v11 = vpop.permute.xlu1 %444  ;;  %v478_v6 = vrot.slane %v2302_v10, 4 }
  0x95   : > { %v2309_v13 = vsel %vm447_vm1, %v441_v8, %v445_v11 }
  0x96   : > { %v466_v63 = vpop.permute.xlu0 %465  ;;  %v487_v18 = vrot.slane %v2309_v13, 4 }
  0x97   : > { %v467_v0 = vmul.f32 %v1599_v62, %v466_v63  ;;  %v1891_v63 = vpack.c.bf16 %v1661_v61, %v1657_v60  ;;  %v625_v60 = vld [vmem:[%s3157_s4 + $0xd0] sm:$0xff] }
  0x98   : > { %468 = vrot.lane.b32.xlu1 %v2288_v3, %s2193_s9  ;;  %471 = vrot.lane.b32.xlu0 %v2309_v13, %s2192_s21  ;;  %v629_v61 = vld [vmem:[%s3157_s4 + $0xf0] sm:$0xff]  ;;  %s1596_s21 = sshll.u32 %s2172_s24, 2 }
  0x99   : > { %v481_v2 = vrot.slane %v467_v0, 4  ;;  %v1656_v0 = vld [vmem:[%s3157_s4 + $0x390] sm:$0xff]  ;;  %p410_p11 = scmp.lt.s32.totalorder %s1596_s21, 7 }
  0x9b   : > { %s3183_s21 = smov (!%p410_p11, %s1596_s21), 7 }
  0x9c   : > { %474 = vrot.lane.b32.xlu1 %v2309_v13, %s2193_s9  ;;  %v1608_v13 = vld [vmem:[%s3157_s4 + $0x210] sm:$0xff]  ;;  %s1597_s9 = sshll.u32 %s3173_s25, 3 }
  0x9d   : > { %s413_s15 = sadd.s32 %s1597_s9, %s3183_s21 }
  0x9e   : > { %s1598_s19 = sshll.u32 %s413_s15, 3 }
  0x9f   : > { %s415_s8 = scalar_lea.vmem %s3160_s7, %s1598_s19 }
 0x106   : > { %v452_v4 = vpop.permute.xlu1 %451  ;;  %v459_v5 = vpop.permute.xlu0 %458 }
 0x107   : > { %v457_v7 = vmul.f32 %v1599_v62, %v452_v4  ;;  %v464_v8 = vmul.f32 %v1600_v1, %v459_v5  ;;  %v1669_v4 = vld [vmem:[%s3157_s4 + $0x3f8] sm:$0xff] }
 0x109   : > { %v490_v9 = vsel %vm489_vm3, %v457_v7, %v478_v6  ;;  %v491_v11 = vsel %vm489_vm3, %v464_v8, %v481_v2  ;;  %v1665_v2 = vld [vmem:[%s3157_s4 + $0x3d8] sm:$0xff]  ;;  %v1664_v7 = vld [vmem:[%s3157_s4 + $0x3d0] sm:$0xff] }
 0x10a   : > { %v469_v12 = vpop.permute.xlu1 %468  ;;  %v1827_v14 = vpack.c.bf16 %v491_v11, %v490_v9  ;;  %v472_v16 = vpop.permute.xlu0 %471  ;;  %v1895_v6 = vpack.c.bf16 %v1669_v4, %v1665_v2  ;;  %v1668_v8 = vld [vmem:[%s3157_s4 + $0x3f0] sm:$0xff]  ;;  %v600_v11 = vld [vmem:[%s3157_s4 + $0x8] sm:$0xff]  ;;  %v1945_v4 = vpack.c.bf16 %v629_v61, %v625_v60 }
 0x10b   : > { %v470_v15 = vmul.f32 %v1600_v1, %v469_v12  ;;  %v473_v17 = vmul.f32 %v1599_v62, %v472_v16  ;;  %v1889_v62 = vpack.c.bf16 %v1652_v59, %v1648_v58  ;;  %v1897_v9 = vpack.c.bf16 %v1668_v8, %v1664_v7  ;;  %v604_v12 = vld [vmem:[%s3157_s4 + $0x28] sm:$0xff]  ;;  %v1672_v60 = vld [vmem:[%s3157_s4 + $0x410] sm:$0xff] }
 0x10c   : > { %1828 = vmatprep.subr.bf16.mxu0 %v1827_v14  ;;  %v1899_v16 = vpack.c.bf16 %v604_v12, %v600_v11  ;;  %v1911_v58 = vpack.c.bf16 %v628_v49, %v624_v48  ;;  %v637_v11 = vld [vmem:[%s3157_s4 + $0x130] sm:$0xff]  ;;  %v640_v12 = vld [vmem:[%s3157_s4 + $0x148] sm:$0xff] }
 0x10d   : > { %v484_v19 = vrot.slane %v470_v15, 4  ;;  %1830 = vmatpush3.bf16.msra.mxu0 %v1827_v14  ;;  %v493_v21 = vsel %vm489_vm3, %v473_v17, %v487_v18  ;;  %v602_v14 = vld [vmem:[%s3157_s4 + $0x18] sm:$0xff]  ;;  %v2194_v15 = vmov 0.0   ;;  %v1671_v48 = vld [vmem:[%s3157_s4 + $0x408] sm:$0xff]  ;;  %v1676_v61 = vld [vmem:[%s3157_s4 + $0x430] sm:$0xff] }
 0x10e   : > { %v475_v20 = vpop.permute.xlu1 %474  ;;  %792 = vmatprep.mubr.f32.mxu1 %v2194_v15  ;;  %v606_v17 = vld [vmem:[%s3157_s4 + $0x38] sm:$0xff]  ;;  %1900 = vmatprep.subr.bf16.mxu1 %v1899_v16  ;;  %v1675_v49 = vld [vmem:[%s3157_s4 + $0x428] sm:$0xff] }
 0x10f   : > { %v492_v10 = vsel %vm489_vm3, %v2288_v3, %v484_v19  ;;  %v476_v25 = vmul.f32 %v1600_v1, %v475_v20  ;;  %v1612_v3 = vld [vmem:[%s3157_s4 + $0x230] sm:$0xff]  ;;  %v1931_v18 = vpack.c.bf16 %v606_v17, %v602_v14  ;;  %v1434_v19 = vld [vmem:[%s3159_s6] sm:$0xff]  ;;  %v2195_v20 = vmov 0   ;;  %v644_v14 = vld [vmem:[%s3157_s4 + $0x168] sm:$0xff] }
 0x110   : > { %v1831_v22 = vpack.c.bf16 %v493_v21, %v492_v10  ;;  %v1869_v30 = vpack.c.bf16 %v1612_v3, %v1608_v13  ;;  %v1660_v1 = vld [vmem:[%s3157_s4 + $0x3b0] sm:$0xff]  ;;  %2149 = vset.pattern.permute.xlu0 %v2195_v20  ;;  %v599_v10 = vld [vmem:[%s3157_s4] sm:$0xff]  ;;  %v610_v13 = vld [vmem:[%s3157_s4 + $0x58] sm:$0xff] }
 0x111   : > { %v1893_v5 = vpack.c.bf16 %v1660_v1, %v1656_v0  ;;  %1437 = vperm.xlu0 %2149, %v1434_v19   ;;  %v603_v21 = vld [vmem:[%s3157_s4 + $0x20] sm:$0xff]  ;;  %v614_v3 = vld [vmem:[%s3157_s4 + $0x78] sm:$0xff] }
 0x112   : > { %1832 = vmatprep.subr.bf16.mxu0 %v1831_v22  ;;  %v1901_v26 = vpack.c.bf16 %v603_v21, %v599_v10  ;;  %v634_v0 = vld [vmem:[%s3157_s4 + $0x118] sm:$0xff]  ;;  %v639_v20 = vld [vmem:[%s3157_s4 + $0x140] sm:$0xff]  ;;  %v1919_v21 = vpack.c.bf16 %v644_v14, %v640_v12  ;;  %v1687_v12 = vld [vmem:[%s3157_s4 + $0x488] sm:$0xff] }
 0x113   : > { %1834 = vmatpush3.bf16.msra.mxu0 %v1831_v22  ;;  %v601_v22 = vld [vmem:[%s3157_s4 + $0x10] sm:$0xff]  ;;  %v638_v1 = vld [vmem:[%s3157_s4 + $0x138] sm:$0xff]  ;;  %v643_v10 = vld [vmem:[%s3157_s4 + $0x160] sm:$0xff] }
 0x114   : > { %1819 = vmatprep.subr.msk.mxu0 %vm489_vm3, %v476_v25  ;;  %v1933_v27 = vpack.c.bf16 %v605_v23, %v601_v22  ;;  %v1947_v8 = vpack.c.bf16 %v638_v1, %v634_v0  ;;  %v642_v16 = vld [vmem:[%s3157_s4 + $0x158] sm:$0xff]  ;;  %v641_v23 = vld [vmem:[%s3157_s4 + $0x150] sm:$0xff]  ;;  %v1691_v14 = vld [vmem:[%s3157_s4 + $0x4a8] sm:$0xff] }
 0x115   : > { %v646_v17 = vld [vmem:[%s3157_s4 + $0x178] sm:$0xff] }
 0x116   : > { %v1951_v22 = vpack.c.bf16 %v646_v17, %v642_v16  ;;  %v1681_v0 = vld [vmem:[%s3157_s4 + $0x458] sm:$0xff] }
 0x117   : > { %1820 = vmatpush3.msk.msra.mxu0 %vm489_vm3, %v476_v25  ;;  %v612_v25 = vld [vmem:[%s3157_s4 + $0x68] sm:$0xff]  ;;  %v1685_v1 = vld [vmem:[%s3157_s4 + $0x478] sm:$0xff] }
 0x118   : > { %1822 = vmatmul.mubr.msk.f32.vlgmr.msra.gmra.mrb[0].mxu0 %vm498_vm2, %v495_v29  ;;  %1868 = vmatprep.subr.bf16.mxu0 %v1867_v28  ;;  %v607_v28 = vld [vmem:[%s3157_s4 + $0x40] sm:$0xff]  ;;  %v1689_v16 = vld [vmem:[%s3157_s4 + $0x498] sm:$0xff] }
 0x119   : > { %1824 = vmatprep.mubr.msk.f32.mxu0 %vm498_vm2, %v496_v31  ;;  %1870 = vmatpush1.bf16.msra.mxu0 %v1869_v30  ;;  %v611_v29 = vld [vmem:[%s3157_s4 + $0x60] sm:$0xff]  ;;  %v1903_v30 = vpack.c.bf16 %v612_v25, %v608_v24  ;;  %v1935_v31 = vpack.c.bf16 %v614_v3, %v610_v13  ;;  %v645_v24 = vld [vmem:[%s3157_s4 + $0x170] sm:$0xff]  ;;  %v648_v25 = vld [vmem:[%s3157_s4 + $0x188] sm:$0xff] }
 0x11a   : > { %1872 = vmatprep.subr.bf16.mxu0 %v1871_v32  ;;  %v609_v32 = vld [vmem:[%s3157_s4 + $0x50] sm:$0xff]  ;;  %v1905_v40 = vpack.c.bf16 %v611_v29, %v607_v28  ;;  %v652_v13 = vld [vmem:[%s3157_s4 + $0x1a8] sm:$0xff]  ;;  %v650_v3 = vld [vmem:[%s3157_s4 + $0x198] sm:$0xff]  ;;  %v1953_v28 = vpack.c.bf16 %v645_v24, %v641_v23 }
 0x11b   : > { %v1937_v41 = vpack.c.bf16 %v613_v33, %v609_v32  ;;  %v647_v29 = vld [vmem:[%s3157_s4 + $0x180] sm:$0xff]  ;;  %v649_v33 = vld [vmem:[%s3157_s4 + $0x190] sm:$0xff]  ;;  %v1693_v17 = vld [vmem:[%s3157_s4 + $0x4b8] sm:$0xff] }
 0x11c   : > { %1825 = vmatmul.mubr.msk.f32.gmra.mrb[2].mxu0 %vm498_vm2, %v497_v37  ;;  %v618_v37 = vld [vmem:[%s3157_s4 + $0x98] sm:$0xff]  ;;  %v1692_v23 = vld [vmem:[%s3157_s4 + $0x4b0] sm:$0xff]  ;;  %v1695_v24 = vld [vmem:[%s3157_s4 + $0x4c8] sm:$0xff] }
 0x11d   : > { %1874 = vmatpush1.bf16.msra.mxu0 %v1873_v38  ;;  %863 = vmatprep.mubr.f32.mxu0 %v2194_v15  ;;  %v622_v38 = vld [vmem:[%s3157_s4 + $0xb8] sm:$0xff] }
 0x11e   : > { %1876 = vmatprep.subr.bf16.mxu0 %v1875_v39 }
 0x121   : > { %1878 = vmatpush1.bf16.msra.mxu0 %v1877_v44  ;;  %v1907_v44 = vpack.c.bf16 %v620_v36, %v616_v34  ;;  %v653_v34 = vld [vmem:[%s3157_s4 + $0x1b0] sm:$0xff]  ;;  %v660_v36 = vld [vmem:[%s3157_s4 + $0x1e8] sm:$0xff] }
 0x122   : > { %1880 = vmatprep.subr.bf16.mxu0 %v1879_v45  ;;  %v1939_v45 = vpack.c.bf16 %v622_v38, %v618_v37  ;;  %v658_v37 = vld [vmem:[%s3157_s4 + $0x1d8] sm:$0xff] }
 0x123   : > { %v662_v38 = vld [vmem:[%s3157_s4 + $0x1f8] sm:$0xff] }
 0x125   : > { %1882 = vmatpush1.bf16.msra.mxu0 %v1881_v50  ;;  %v626_v50 = vld [vmem:[%s3157_s4 + $0xd8] sm:$0xff] }
 0x126   : > { %1884 = vmatprep.subr.bf16.mxu0 %v1883_v51  ;;  %v630_v51 = vld [vmem:[%s3157_s4 + $0xf8] sm:$0xff] }
 0x127   : > { %v1943_v59 = vpack.c.bf16 %v630_v51, %v626_v50  ;;  %v1673_v50 = vld [vmem:[%s3157_s4 + $0x418] sm:$0xff] }
 0x128   : > { %v1677_v51 = vld [vmem:[%s3157_s4 + $0x438] sm:$0xff] }
 0x129   : > { %1886 = vmatpush1.bf16.msra.mxu0 %v1885_v56  ;;  %v623_v56 = vld [vmem:[%s3157_s4 + $0xc0] sm:$0xff] }
 0x12a   : > { %1888 = vmatprep.subr.bf16.mxu0 %v1887_v57  ;;  %v627_v57 = vld [vmem:[%s3157_s4 + $0xe0] sm:$0xff] }
 0x12b   : > { %v1913_v2 = vpack.c.bf16 %v627_v57, %v623_v56  ;;  %v1670_v56 = vld [vmem:[%s3157_s4 + $0x400] sm:$0xff] }
 0x12c   : > { %v1674_v57 = vld [vmem:[%s3157_s4 + $0x420] sm:$0xff] }
 0x12d   : > { %1890 = vmatpush1.bf16.msra.mxu0 %v1889_v62  ;;  %v632_v62 = vld [vmem:[%s3157_s4 + $0x108] sm:$0xff] }
 0x12e   : > { %1892 = vmatprep.subr.bf16.mxu0 %v1891_v63  ;;  %v636_v63 = vld [vmem:[%s3157_s4 + $0x128] sm:$0xff] }
 0x12f   : > { %v1915_v7 = vpack.c.bf16 %v636_v63, %v632_v62  ;;  %v1679_v62 = vld [vmem:[%s3157_s4 + $0x448] sm:$0xff] }
 0x130   : > { %v1683_v63 = vld [vmem:[%s3157_s4 + $0x468] sm:$0xff] }
 0x131   : > { %1894 = vmatpush1.bf16.msra.mxu0 %v1893_v5  ;;  %v631_v5 = vld [vmem:[%s3157_s4 + $0x100] sm:$0xff] }
 0x132   : > { %1896 = vmatprep.subr.bf16.mxu0 %v1895_v6  ;;  %v635_v6 = vld [vmem:[%s3157_s4 + $0x120] sm:$0xff] }
 0x135   : > { %1898 = vmatpush1.bf16.msra.mxu0 %v1897_v9  ;;  %v633_v9 = vld [vmem:[%s3157_s4 + $0x110] sm:$0xff] }
 0x136   : > { %1932 = vmatprep.subr.bf16.mxu0 %v1931_v18  ;;  %v1917_v18 = vpack.c.bf16 %v635_v6, %v631_v5  ;;  %v1949_v19 = vpack.c.bf16 %v637_v11, %v633_v9  ;;  %v1678_v5 = vld [vmem:[%s3157_s4 + $0x440] sm:$0xff]  ;;  %v1680_v9 = vld [vmem:[%s3157_s4 + $0x450] sm:$0xff] }
 0x137   : > { %v1682_v6 = vld [vmem:[%s3157_s4 + $0x460] sm:$0xff]  ;;  %v1684_v11 = vld [vmem:[%s3157_s4 + $0x470] sm:$0xff] }
 0x1eb   : > { %v1823_v35 = vpop.f32.mrb[0].mxu0 }
 0x1ec   : > { %v2599_v39 = vpop.f32.mrb[1].mxu0  ;;  %793 = vmatmul.mubr.f32.vlgmr.msra.gmra.mrb[0].mxu1 %v1823_v35  ;;  %864 = vmatmul.mubr.f32.vlgmr.msra.gmra.mrb[4].mxu0 %v1823_v35  ;;  %v656_v35 = vld [vmem:[%s3157_s4 + $0x1c8] sm:$0xff] }
 0x1ed   : > { %1902 = vmatpush1.bf16.msra.mxu1 %v1901_v26  ;;  %1934 = vmatpush1.bf16.msra.mxu0 %v1933_v27  ;;  %v654_v26 = vld [vmem:[%s3157_s4 + $0x1b8] sm:$0xff]  ;;  %v1921_v27 = vpack.c.bf16 %v643_v10, %v639_v20  ;;  %v1686_v20 = vld [vmem:[%s3157_s4 + $0x480] sm:$0xff] }
 0x1ee   : > { %1904 = vmatprep.subr.bf16.mxu1 %v1903_v30  ;;  %1936 = vmatprep.subr.bf16.mxu0 %v1935_v31  ;;  %v651_v30 = vld [vmem:[%s3157_s4 + $0x1a0] sm:$0xff]  ;;  %v1923_v31 = vpack.c.bf16 %v652_v13, %v648_v25  ;;  %v1955_v32 = vpack.c.bf16 %v654_v26, %v650_v3  ;;  %v1699_v25 = vld [vmem:[%s3157_s4 + $0x4e8] sm:$0xff]  ;;  %v1697_v13 = vld [vmem:[%s3157_s4 + $0x4d8] sm:$0xff] }
 0x1ef   : > { %934 = vmatprep.mubr.f32.mxu1 %v2194_v15  ;;  %1005 = vmatprep.mubr.f32.mxu0 %v2194_v15  ;;  %v2627_v52 = vpop.f32.mrb[2].mxu0  ;;  %v1690_v10 = vld [vmem:[%s3157_s4 + $0x4a0] sm:$0xff]  ;;  %v1701_v3 = vld [vmem:[%s3157_s4 + $0x4f8] sm:$0xff] }
 0x1f0   : > { %v2629_v53 = vpop.f32.mrb[3].mxu0  ;;  %v1973_v26 = vpack.c.bf16 %v1690_v10, %v1686_v20  ;;  %v1730_v20 = vld [vmem:[%s3157_s4 + $0x5e0] sm:$0xff] }
 0x1f1   : > { %1906 = vmatpush1.bf16.msra.mxu1 %v1905_v40  ;;  %1938 = vmatpush1.bf16.msra.mxu0 %v1937_v41  ;;  %v1925_v40 = vpack.c.bf16 %v651_v30, %v647_v29  ;;  %v1957_v41 = vpack.c.bf16 %v653_v34, %v649_v33  ;;  %v1698_v29 = vld [vmem:[%s3157_s4 + $0x4e0] sm:$0xff]  ;;  %v1975_v30 = vpack.c.bf16 %v1699_v25, %v1695_v24  ;;  %v1700_v33 = vld [vmem:[%s3157_s4 + $0x4f0] sm:$0xff]  ;;  %v1703_v34 = vld [vmem:[%s3157_s4 + $0x508] sm:$0xff] }
 0x1f2   : > { %1908 = vmatprep.subr.bf16.mxu1 %v1907_v44  ;;  %1940 = vmatprep.subr.bf16.mxu0 %v1939_v45  ;;  %v1927_v44 = vpack.c.bf16 %v660_v36, %v656_v35  ;;  %v1959_v45 = vpack.c.bf16 %v662_v38, %v658_v37  ;;  %v1707_v35 = vld [vmem:[%s3157_s4 + $0x528] sm:$0xff]  ;;  %v1705_v36 = vld [vmem:[%s3157_s4 + $0x518] sm:$0xff] }
 0x1f3   : > { %v1709_v37 = vld [vmem:[%s3157_s4 + $0x538] sm:$0xff]  ;;  %v1739_v24 = vld [vmem:[%s3157_s4 + $0x628] sm:$0xff] }
 0x1f4   : > { %v1737_v25 = vld [vmem:[%s3157_s4 + $0x618] sm:$0xff] }
 0x1f5   : > { %1910 = vmatpush1.bf16.msra.mxu1 %v1909_v54  ;;  %1942 = vmatpush1.bf16.msra.mxu0 %v1941_v55  ;;  %v1929_v54 = vpack.c.bf16 %v659_v43, %v655_v42  ;;  %v1961_v55 = vpack.c.bf16 %v661_v47, %v657_v46  ;;  %v1706_v42 = vld [vmem:[%s3157_s4 + $0x520] sm:$0xff]  ;;  %v1979_v43 = vpack.c.bf16 %v1707_v35, %v1703_v34  ;;  %v1708_v46 = vld [vmem:[%s3157_s4 + $0x530] sm:$0xff]  ;;  %v1711_v47 = vld [vmem:[%s3157_s4 + $0x548] sm:$0xff] }
 0x1f6   : > { %1912 = vmatprep.subr.bf16.mxu1 %v1911_v58  ;;  %1944 = vmatprep.subr.bf16.mxu0 %v1943_v59  ;;  %v1963_v58 = vpack.c.bf16 %v1675_v49, %v1671_v48  ;;  %v1995_v59 = vpack.c.bf16 %v1677_v51, %v1673_v50  ;;  %v1715_v48 = vld [vmem:[%s3157_s4 + $0x568] sm:$0xff]  ;;  %v1713_v49 = vld [vmem:[%s3157_s4 + $0x558] sm:$0xff] }
 0x1f7   : > { %v1717_v50 = vld [vmem:[%s3157_s4 + $0x578] sm:$0xff]  ;;  %v1747_v34 = vld [vmem:[%s3157_s4 + $0x668] sm:$0xff] }
 0x1f8   : > { %v1745_v35 = vld [vmem:[%s3157_s4 + $0x658] sm:$0xff] }
 0x1f9   : > { %1914 = vmatpush1.bf16.msra.mxu1 %v1913_v2  ;;  %1946 = vmatpush1.bf16.msra.mxu0 %v1945_v4  ;;  %v1965_v2 = vpack.c.bf16 %v1674_v57, %v1670_v56  ;;  %v1997_v4 = vpack.c.bf16 %v1676_v61, %v1672_v60  ;;  %v1714_v56 = vld [vmem:[%s3157_s4 + $0x560] sm:$0xff]  ;;  %v1983_v57 = vpack.c.bf16 %v1715_v48, %v1711_v47  ;;  %v1716_v60 = vld [vmem:[%s3157_s4 + $0x570] sm:$0xff]  ;;  %v1719_v61 = vld [vmem:[%s3157_s4 + $0x588] sm:$0xff] }
 0x1fa   : > { %1916 = vmatprep.subr.bf16.mxu1 %v1915_v7  ;;  %1948 = vmatprep.subr.bf16.mxu0 %v1947_v8  ;;  %v1967_v7 = vpack.c.bf16 %v1683_v63, %v1679_v62  ;;  %v1999_v8 = vpack.c.bf16 %v1685_v1, %v1681_v0  ;;  %v1723_v62 = vld [vmem:[%s3157_s4 + $0x5a8] sm:$0xff]  ;;  %v1721_v63 = vld [vmem:[%s3157_s4 + $0x598] sm:$0xff] }
 0x1fb   : > { %v1725_v0 = vld [vmem:[%s3157_s4 + $0x5b8] sm:$0xff]  ;;  %v1755_v47 = vld [vmem:[%s3157_s4 + $0x6a8] sm:$0xff] }
 0x1fc   : > { %v1753_v48 = vld [vmem:[%s3157_s4 + $0x698] sm:$0xff] }
 0x1fd   : > { %1918 = vmatpush1.bf16.msra.mxu1 %v1917_v18  ;;  %1950 = vmatpush1.bf16.msra.mxu0 %v1949_v19  ;;  %v1969_v18 = vpack.c.bf16 %v1682_v6, %v1678_v5  ;;  %v2001_v19 = vpack.c.bf16 %v1684_v11, %v1680_v9  ;;  %v1722_v5 = vld [vmem:[%s3157_s4 + $0x5a0] sm:$0xff]  ;;  %v1987_v6 = vpack.c.bf16 %v1723_v62, %v1719_v61  ;;  %v1724_v9 = vld [vmem:[%s3157_s4 + $0x5b0] sm:$0xff]  ;;  %v1727_v11 = vld [vmem:[%s3157_s4 + $0x5c8] sm:$0xff] }
 0x1fe   : > { %1920 = vmatprep.subr.bf16.mxu1 %v1919_v21  ;;  %1952 = vmatprep.subr.bf16.mxu0 %v1951_v22  ;;  %v1971_v21 = vpack.c.bf16 %v1691_v14, %v1687_v12  ;;  %v2003_v22 = vpack.c.bf16 %v1693_v17, %v1689_v16  ;;  %v1731_v12 = vld [vmem:[%s3157_s4 + $0x5e8] sm:$0xff]  ;;  %v1729_v14 = vld [vmem:[%s3157_s4 + $0x5d8] sm:$0xff] }
 0x1ff   : > { %v1733_v16 = vld [vmem:[%s3157_s4 + $0x5f8] sm:$0xff]  ;;  %v1991_v10 = vpack.c.bf16 %v1731_v12, %v1727_v11 }
 0x200   : > { %v1761_v61 = vld [vmem:[%s3157_s4 + $0x6d8] sm:$0xff] }
 0x201   : > { %1922 = vmatpush1.bf16.msra.mxu1 %v1921_v27  ;;  %1954 = vmatpush1.bf16.msra.mxu0 %v1953_v28  ;;  %v1694_v28 = vld [vmem:[%s3157_s4 + $0x4c0] sm:$0xff]  ;;  %v1765_v62 = vld [vmem:[%s3157_s4 + $0x6f8] sm:$0xff] }
 0x202   : > { %1924 = vmatprep.subr.bf16.mxu1 %v1923_v31  ;;  %1956 = vmatprep.subr.bf16.mxu0 %v1955_v32  ;;  %v2007_v31 = vpack.c.bf16 %v1701_v3, %v1697_v13  ;;  %v1696_v32 = vld [vmem:[%s3157_s4 + $0x4d0] sm:$0xff]  ;;  %v1977_v38 = vpack.c.bf16 %v1698_v29, %v1694_v28  ;;  %v1741_v13 = vld [vmem:[%s3157_s4 + $0x638] sm:$0xff]  ;;  %v1738_v28 = vld [vmem:[%s3157_s4 + $0x620] sm:$0xff] }
 0x203   : > { %v1773_v11 = vld [vmem:[%s3157_s4 + $0x738] sm:$0xff] }
 0x205   : > { %1926 = vmatpush1.bf16.msra.mxu1 %v1925_v40  ;;  %1958 = vmatpush1.bf16.msra.mxu0 %v1957_v41  ;;  %v2009_v40 = vpack.c.bf16 %v1700_v33, %v1696_v32  ;;  %v1702_v41 = vld [vmem:[%s3157_s4 + $0x500] sm:$0xff]  ;;  %v1740_v32 = vld [vmem:[%s3157_s4 + $0x630] sm:$0xff]  ;;  %v1743_v33 = vld [vmem:[%s3157_s4 + $0x648] sm:$0xff] }
 0x206   : > { %1928 = vmatprep.subr.bf16.mxu1 %v1927_v44  ;;  %1960 = vmatprep.subr.bf16.mxu0 %v1959_v45  ;;  %v2011_v44 = vpack.c.bf16 %v1709_v37, %v1705_v36  ;;  %v1704_v45 = vld [vmem:[%s3157_s4 + $0x510] sm:$0xff]  ;;  %v1981_v51 = vpack.c.bf16 %v1706_v42, %v1702_v41  ;;  %v1749_v36 = vld [vmem:[%s3157_s4 + $0x678] sm:$0xff]  ;;  %v1746_v41 = vld [vmem:[%s3157_s4 + $0x660] sm:$0xff]  ;;  %v2031_v42 = vpack.c.bf16 %v1747_v34, %v1743_v33 }
 0x207   : > { %v1789_v33 = vld [vmem:[%s3157_s4 + $0x7b8] sm:$0xff] }
 0x209   : > { %1930 = vmatpush1.bf16.msra.mxu1 %v1929_v54  ;;  %1962 = vmatpush1.bf16.msra.mxu0 %v1961_v55  ;;  %v2013_v54 = vpack.c.bf16 %v1708_v46, %v1704_v45  ;;  %v1710_v55 = vld [vmem:[%s3157_s4 + $0x540] sm:$0xff]  ;;  %v1748_v45 = vld [vmem:[%s3157_s4 + $0x670] sm:$0xff]  ;;  %v1751_v46 = vld [vmem:[%s3157_s4 + $0x688] sm:$0xff] }
 0x20a   : > { %1964 = vmatprep.subr.bf16.mxu1 %v1963_v58  ;;  %1996 = vmatprep.subr.bf16.mxu0 %v1995_v59  ;;  %v2015_v58 = vpack.c.bf16 %v1717_v50, %v1713_v49  ;;  %v1712_v59 = vld [vmem:[%s3157_s4 + $0x550] sm:$0xff]  ;;  %v1985_v1 = vpack.c.bf16 %v1714_v56, %v1710_v55  ;;  %v1757_v49 = vld [vmem:[%s3157_s4 + $0x6b8] sm:$0xff]  ;;  %v1754_v55 = vld [vmem:[%s3157_s4 + $0x6a0] sm:$0xff]  ;;  %v2035_v56 = vpack.c.bf16 %v1755_v47, %v1751_v46 }
 0x20b   : > { %v1797_v46 = vld [vmem:[%s3157_s4 + $0x7f8] sm:$0xff] }
 0x20c   : > { %935 = vmatmul.mubr.f32.vlgmr.msra.gmra.mrb[0].mxu1 %v2599_v39  ;;  %1006 = vmatmul.mubr.f32.vlgmr.msra.gmra.mrb[4].mxu0 %v2599_v39  ;;  %v1688_v39 = vld [vmem:[%s3157_s4 + $0x490] sm:$0xff] }
 0x20d   : > { %1966 = vmatpush1.bf16.msra.mxu1 %v1965_v2  ;;  %1998 = vmatpush1.bf16.msra.mxu0 %v1997_v4  ;;  %v2005_v27 = vpack.c.bf16 %v1692_v23, %v1688_v39  ;;  %v2017_v2 = vpack.c.bf16 %v1716_v60, %v1712_v59  ;;  %v1718_v4 = vld [vmem:[%s3157_s4 + $0x580] sm:$0xff]  ;;  %v1732_v39 = vld [vmem:[%s3157_s4 + $0x5f0] sm:$0xff]  ;;  %v1735_v23 = vld [vmem:[%s3157_s4 + $0x608] sm:$0xff] }
 0x20e   : > { %1968 = vmatprep.subr.bf16.mxu1 %v1967_v7  ;;  %2000 = vmatprep.subr.bf16.mxu0 %v1999_v8  ;;  %v2019_v7 = vpack.c.bf16 %v1725_v0, %v1721_v63  ;;  %v1720_v8 = vld [vmem:[%s3157_s4 + $0x590] sm:$0xff]  ;;  %v1989_v17 = vpack.c.bf16 %v1722_v5, %v1718_v4  ;;  %v2027_v29 = vpack.c.bf16 %v1739_v24, %v1735_v23  ;;  %v1759_v59 = vld [vmem:[%s3157_s4 + $0x6c8] sm:$0xff]  ;;  %v1781_v23 = vld [vmem:[%s3157_s4 + $0x778] sm:$0xff] }
 0x20f   : > { %1141 = vmatprep.mubr.f32.mxu1 %v2194_v15  ;;  %1212 = vmatprep.mubr.f32.mxu0 %v2194_v15  ;;  %v1763_v60 = vld [vmem:[%s3157_s4 + $0x6e8] sm:$0xff]  ;;  %v2071_v5 = vpack.c.bf16 %v1765_v62, %v1761_v61 }
 0x210   : > { %v2039_v4 = vpack.c.bf16 %v1763_v60, %v1759_v59 }
 0x211   : > { %1970 = vmatpush1.bf16.msra.mxu1 %v1969_v18  ;;  %2002 = vmatpush1.bf16.msra.mxu0 %v2001_v19  ;;  %v2021_v18 = vpack.c.bf16 %v1724_v9, %v1720_v8  ;;  %v1726_v19 = vld [vmem:[%s3157_s4 + $0x5c0] sm:$0xff]  ;;  %v1771_v8 = vld [vmem:[%s3157_s4 + $0x728] sm:$0xff]  ;;  %v1769_v9 = vld [vmem:[%s3157_s4 + $0x718] sm:$0xff] }
 0x212   : > { %1972 = vmatprep.subr.bf16.mxu1 %v1971_v21  ;;  %2004 = vmatprep.subr.bf16.mxu0 %v2003_v22  ;;  %v2023_v21 = vpack.c.bf16 %v1733_v16, %v1729_v14  ;;  %v1728_v22 = vld [vmem:[%s3157_s4 + $0x5d0] sm:$0xff]  ;;  %v1993_v3 = vpack.c.bf16 %v1730_v20, %v1726_v19  ;;  %v1766_v16 = vld [vmem:[%s3157_s4 + $0x700] sm:$0xff]  ;;  %v2075_v19 = vpack.c.bf16 %v1773_v11, %v1769_v9 }
 0x213   : > { %v1768_v20 = vld [vmem:[%s3157_s4 + $0x710] sm:$0xff] }
 0x215   : > { %1974 = vmatpush1.bf16.msra.mxu1 %v1973_v26  ;;  %2006 = vmatpush1.bf16.msra.mxu0 %v2005_v27  ;;  %v2025_v26 = vpack.c.bf16 %v1732_v39, %v1728_v22  ;;  %v1734_v27 = vld [vmem:[%s3157_s4 + $0x600] sm:$0xff]  ;;  %v1779_v22 = vld [vmem:[%s3157_s4 + $0x768] sm:$0xff]  ;;  %v1777_v39 = vld [vmem:[%s3157_s4 + $0x758] sm:$0xff] }
 0x216   : > { %1976 = vmatprep.subr.bf16.mxu1 %v1975_v30  ;;  %2008 = vmatprep.subr.bf16.mxu0 %v2007_v31  ;;  %v2059_v30 = vpack.c.bf16 %v1741_v13, %v1737_v25  ;;  %v1736_v31 = vld [vmem:[%s3157_s4 + $0x610] sm:$0xff]  ;;  %v2029_v37 = vpack.c.bf16 %v1738_v28, %v1734_v27  ;;  %v1774_v13 = vld [vmem:[%s3157_s4 + $0x740] sm:$0xff]  ;;  %v2079_v27 = vpack.c.bf16 %v1781_v23, %v1777_v39 }
 0x217   : > { %v1776_v28 = vld [vmem:[%s3157_s4 + $0x750] sm:$0xff] }
 0x219   : > { %1978 = vmatpush1.bf16.msra.mxu1 %v1977_v38  ;;  %2010 = vmatpush1.bf16.msra.mxu0 %v2009_v40  ;;  %v2061_v38 = vpack.c.bf16 %v1740_v32, %v1736_v31  ;;  %v1742_v40 = vld [vmem:[%s3157_s4 + $0x640] sm:$0xff]  ;;  %v1787_v31 = vld [vmem:[%s3157_s4 + $0x7a8] sm:$0xff]  ;;  %v1785_v32 = vld [vmem:[%s3157_s4 + $0x798] sm:$0xff] }
 0x21a   : > { %1980 = vmatprep.subr.bf16.mxu1 %v1979_v43  ;;  %2012 = vmatprep.subr.bf16.mxu0 %v2011_v44  ;;  %v2063_v43 = vpack.c.bf16 %v1749_v36, %v1745_v35  ;;  %v1744_v44 = vld [vmem:[%s3157_s4 + $0x650] sm:$0xff]  ;;  %v2033_v50 = vpack.c.bf16 %v1746_v41, %v1742_v40  ;;  %v1782_v36 = vld [vmem:[%s3157_s4 + $0x780] sm:$0xff]  ;;  %v2083_v40 = vpack.c.bf16 %v1789_v33, %v1785_v32 }
 0x21b   : > { %v1784_v41 = vld [vmem:[%s3157_s4 + $0x790] sm:$0xff] }
 0x21d   : > { %1982 = vmatpush1.bf16.msra.mxu1 %v1981_v51  ;;  %2014 = vmatpush1.bf16.msra.mxu0 %v2013_v54  ;;  %v2065_v51 = vpack.c.bf16 %v1748_v45, %v1744_v44  ;;  %v1750_v54 = vld [vmem:[%s3157_s4 + $0x680] sm:$0xff]  ;;  %v1795_v44 = vld [vmem:[%s3157_s4 + $0x7e8] sm:$0xff]  ;;  %v1793_v45 = vld [vmem:[%s3157_s4 + $0x7d8] sm:$0xff] }
 0x21e   : > { %1984 = vmatprep.subr.bf16.mxu1 %v1983_v57  ;;  %2016 = vmatprep.subr.bf16.mxu0 %v2015_v58  ;;  %v2067_v57 = vpack.c.bf16 %v1757_v49, %v1753_v48  ;;  %v1756_v58 = vld [vmem:[%s3157_s4 + $0x6b0] sm:$0xff]  ;;  %v2037_v63 = vpack.c.bf16 %v1754_v55, %v1750_v54  ;;  %v1790_v49 = vld [vmem:[%s3157_s4 + $0x7c0] sm:$0xff] }
 0x21f   : > { %v1794_v54 = vld [vmem:[%s3157_s4 + $0x7e0] sm:$0xff]  ;;  %v1792_v55 = vld [vmem:[%s3157_s4 + $0x7d0] sm:$0xff] }
 0x221   : > { %1986 = vmatpush1.bf16.msra.mxu1 %v1985_v1  ;;  %2018 = vmatpush1.bf16.msra.mxu0 %v2017_v2  ;;  %v1758_v1 = vld [vmem:[%s3157_s4 + $0x6c0] sm:$0xff] }
 0x222   : > { %1988 = vmatprep.subr.bf16.mxu1 %v1987_v6  ;;  %2020 = vmatprep.subr.bf16.mxu0 %v2019_v7  ;;  %v1762_v2 = vld [vmem:[%s3157_s4 + $0x6e0] sm:$0xff]  ;;  %v1764_v6 = vld [vmem:[%s3157_s4 + $0x6f0] sm:$0xff]  ;;  %v1767_v7 = vld [vmem:[%s3157_s4 + $0x708] sm:$0xff] }
 0x223   : > { %v2041_v12 = vpack.c.bf16 %v1762_v2, %v1758_v1 }
 0x225   : > { %1990 = vmatpush1.bf16.msra.mxu1 %v1989_v17  ;;  %2022 = vmatpush1.bf16.msra.mxu0 %v2021_v18  ;;  %v1770_v17 = vld [vmem:[%s3157_s4 + $0x720] sm:$0xff]  ;;  %v2043_v18 = vpack.c.bf16 %v1771_v8, %v1767_v7 }
 0x226   : > { %1992 = vmatprep.subr.bf16.mxu1 %v1991_v10  ;;  %2024 = vmatprep.subr.bf16.mxu0 %v2023_v21  ;;  %v1772_v10 = vld [vmem:[%s3157_s4 + $0x730] sm:$0xff]  ;;  %v1775_v21 = vld [vmem:[%s3157_s4 + $0x748] sm:$0xff]  ;;  %v2045_v24 = vpack.c.bf16 %v1770_v17, %v1766_v16 }
 0x227   : > { %v2077_v25 = vpack.c.bf16 %v1772_v10, %v1768_v20 }
 0x229   : > { %1994 = vmatpush1.bf16.msra.mxu1 %v1993_v3  ;;  %2026 = vmatpush1.bf16.msra.mxu0 %v2025_v26  ;;  %v1778_v3 = vld [vmem:[%s3157_s4 + $0x760] sm:$0xff]  ;;  %v2047_v26 = vpack.c.bf16 %v1779_v22, %v1775_v21 }
 0x22a   : > { %2028 = vmatprep.subr.bf16.mxu1 %v2027_v29  ;;  %2060 = vmatprep.subr.bf16.mxu0 %v2059_v30  ;;  %v1780_v29 = vld [vmem:[%s3157_s4 + $0x770] sm:$0xff]  ;;  %v1783_v30 = vld [vmem:[%s3157_s4 + $0x788] sm:$0xff]  ;;  %v2049_v34 = vpack.c.bf16 %v1778_v3, %v1774_v13 }
 0x22b   : > { %v2081_v35 = vpack.c.bf16 %v1780_v29, %v1776_v28 }
 0x22c   : > { %1142 = vmatmul.mubr.f32.vlgmr.msra.gmra.mrb[0].mxu1 %v2629_v53  ;;  %1213 = vmatmul.mubr.f32.vlgmr.msra.gmra.mrb[4].mxu0 %v2629_v53  ;;  %v1752_v53 = vld [vmem:[%s3157_s4 + $0x690] sm:$0xff] }
 0x22d   : > { %2030 = vmatpush1.bf16.msra.mxu1 %v2029_v37  ;;  %2062 = vmatpush1.bf16.msra.mxu0 %v2061_v38  ;;  %v2069_v0 = vpack.c.bf16 %v1756_v58, %v1752_v53  ;;  %v1786_v37 = vld [vmem:[%s3157_s4 + $0x7a0] sm:$0xff]  ;;  %v2051_v38 = vpack.c.bf16 %v1787_v31, %v1783_v30  ;;  %v1438_v58 = vpop.permute.xlu0 %1437 }
 0x22e   : > { %2032 = vmatprep.subr.bf16.mxu1 %v2031_v42  ;;  %2064 = vmatprep.subr.bf16.mxu0 %v2063_v43  ;;  %v1788_v42 = vld [vmem:[%s3157_s4 + $0x7b0] sm:$0xff]  ;;  %v1791_v43 = vld [vmem:[%s3157_s4 + $0x7c8] sm:$0xff]  ;;  %v2053_v47 = vpack.c.bf16 %v1786_v37, %v1782_v36 }
 0x22f   : > { %1352 = vmatprep.mubr.f32.mxu1 %v2194_v15  ;;  %1423 = vmatprep.mubr.f32.mxu0 %v2194_v15  ;;  %v1760_v15 = vld [vmem:[%s3157_s4 + $0x6d0] sm:$0xff]  ;;  %v2085_v48 = vpack.c.bf16 %v1788_v42, %v1784_v41 }
 0x230   : > { %v2073_v14 = vpack.c.bf16 %v1764_v6, %v1760_v15 }
 0x231   : > { %2034 = vmatpush1.bf16.msra.mxu1 %v2033_v50  ;;  %2066 = vmatpush1.bf16.msra.mxu0 %v2065_v51  ;;  %v2055_v50 = vpack.c.bf16 %v1795_v44, %v1791_v43  ;;  %v2087_v51 = vpack.c.bf16 %v1797_v46, %v1793_v45 }
 0x232   : > { %2036 = vmatprep.subr.bf16.mxu1 %v2035_v56  ;;  %2068 = vmatprep.subr.bf16.mxu0 %v2067_v57  ;;  %v1796_v56 = vld [vmem:[%s3157_s4 + $0x7f0] sm:$0xff]  ;;  %v2057_v57 = vpack.c.bf16 %v1794_v54, %v1790_v49 }
 0x233   : > { %v2089_v53 = vpack.c.bf16 %v1796_v56, %v1792_v55 }
 0x235   : > { %2038 = vmatpush1.bf16.msra.mxu1 %v2037_v63  ;;  %2070 = vmatpush1.bf16.msra.mxu0 %v2069_v0 }
 0x236   : > { %2040 = vmatprep.subr.bf16.mxu1 %v2039_v4  ;;  %2072 = vmatprep.subr.bf16.mxu0 %v2071_v5 }
 0x239   : > { %2042 = vmatpush1.bf16.msra.mxu1 %v2041_v12  ;;  %2074 = vmatpush1.bf16.msra.mxu0 %v2073_v14 }
 0x23a   : > { %2044 = vmatprep.subr.bf16.mxu1 %v2043_v18  ;;  %2076 = vmatprep.subr.bf16.mxu0 %v2075_v19 }
 0x23d   : > { %2046 = vmatpush1.bf16.msra.mxu1 %v2045_v24  ;;  %2078 = vmatpush1.bf16.msra.mxu0 %v2077_v25 }
 0x23e   : > { %2048 = vmatprep.subr.bf16.mxu1 %v2047_v26  ;;  %2080 = vmatprep.subr.bf16.mxu0 %v2079_v27 }
 0x241   : > { %2050 = vmatpush1.bf16.msra.mxu1 %v2049_v34  ;;  %2082 = vmatpush1.bf16.msra.mxu0 %v2081_v35 }
 0x242   : > { %2052 = vmatprep.subr.bf16.mxu1 %v2051_v38  ;;  %2084 = vmatprep.subr.bf16.mxu0 %v2083_v40 }
 0x245   : > { %2054 = vmatpush1.bf16.msra.mxu1 %v2053_v47  ;;  %2086 = vmatpush1.bf16.msra.mxu0 %v2085_v48 }
 0x246   : > { %2056 = vmatprep.subr.bf16.mxu1 %v2055_v50  ;;  %2088 = vmatprep.subr.bf16.mxu0 %v2087_v51 }
 0x249   : > { %2058 = vmatpush1.bf16.msra.mxu1 %v2057_v57  ;;  %2090 = vmatpush1.bf16.msra.mxu0 %v2089_v53 }
 0x24c   : > { %1353 = vmatmul.mubr.f32.vlgmr.msra.gmra.mrb[0].mxu1 %v2627_v52  ;;  %1424 = vmatmul.mubr.f32.vlgmr.msra.gmra.mrb[4].mxu0 %v2627_v52 }
 0x31f   : > { %v1354_v59 = vpop.f32.mrb[0].mxu1  ;;  %v1425_v60 = vpop.f32.mrb[4].mxu0 }
 0x320   : > { %v1440_v61 = vadd.f32 %v1438_v58, %v1354_v59  ;;  %v1442_v62 = vadd.f32 %v1438_v58, %v1425_v60  ;;  %v1356_v63 = vpop.f32.mrb[1].mxu1  ;;  %v1427_v0 = vpop.f32.mrb[5].mxu0 }
 0x321   : > { %v1441_v1 = vadd.f32 %v1438_v58, %v1356_v63  ;;  %v1443_v2 = vadd.f32 %v1438_v58, %v1427_v0 }
 0x322   : > { %1444 = vst [vmem:[%s415_s8] sm:$0xff] %v1440_v61  ;;  %1446 = vst [vmem:[%s415_s8 + $0x10] sm:$0xff] %v1442_v62 }
 0x323   : > { %1445 = vst [vmem:[%s415_s8 + $0x8] sm:$0xff] %v1441_v1  ;;  %1447 = vst [vmem:[%s415_s8 + $0x18] sm:$0xff] %v1443_v2 }
 0x324 PF: > { %s17_s28 = sadd.s32 1, %s2188_s28   ;;  %s3162_s24 = smov %s2180_s26 }
 0x325   : > { %p14_p12 = scmp.ge.s32.totalorder %s17_s28, 6   ;;  %s3163_s25 = smov %s2184_s27 }
 0x326   : > { %s3164_s26 = smov %s3167_s29  ;;  %s3165_s27 = smov %s3171_s30 }
 0x327   :  { %16 = sbr.rel (!%p14_p12) target bundleno = 3 (0x3), region = 87 }

</bundles_post_ra>
